<compile_context>
chip_gen: v7x
topology: tpu7x:2x2x1
jax: 0.10.0
libtpu: 0.0.40
codegen_flags: <defaults>
</compile_context>

<pallas_src>
import functools

import jax
import jax.numpy as jnp
import numpy as np
from jax import lax
from jax.experimental import pallas as pl
from jax.experimental.pallas import tpu as pltpu


# ----------------------------------------------------------------------------
# Generation-aware tile target: bigger tiles on 128 MiB-VMEM parts (v5e/v6e),
# conservative on 64 MiB parts (v7x).  Falls back to 256 if the query fails.
# ----------------------------------------------------------------------------
def _default_tile_target():
    try:
        vmem = pltpu.get_tpu_info().vmem_capacity_bytes
        return 512 if vmem >= 100 * 1024 * 1024 else 256
    except Exception:
        return 256


_TILE_TARGET = _default_tile_target()


# ----------------------------------------------------------------------------
# Tiled matmul (+ fused bias):  out = A @ B (+ bias)   or   A @ B^T (+ bias)
# ----------------------------------------------------------------------------
def _matmul_bias_kernel(a_ref, b_ref, bias_ref, o_ref, acc_ref, *, trans_rhs):
    @pl.when(pl.program_id(2) == 0)
    def _init():
        acc_ref[...] = jnp.zeros_like(acc_ref)

    dims = (((1,), (1,)), ((), ())) if trans_rhs else (((1,), (0,)), ((), ()))
    acc_ref[...] += lax.dot_general(
        a_ref[...], b_ref[...], dims, preferred_element_type=jnp.float32)

    @pl.when(pl.program_id(2) == pl.num_programs(2) - 1)
    def _store():
        o_ref[...] = (acc_ref[...] + bias_ref[...]).astype(o_ref.dtype)


def _pad_axis(x, axis, size):
    pad = size - x.shape[axis]
    if pad == 0:
        return x
    widths = [(0, 0)] * x.ndim
    widths[axis] = (0, pad)
    return jnp.pad(x, widths)


def matmul_bias(a, b, bias=None, *, trans_b=False,
                tm=None, tn=None, tk=None, out_dtype=jnp.float32):
    """Tiled Pallas matmul: a @ b (+bias), or a @ b.T (+bias) when trans_b=True."""
    tm = _TILE_TARGET if tm is None else tm
    tn = _TILE_TARGET if tn is None else tn
    tk = _TILE_TARGET if tk is None else tk

    M, K = a.shape
    if trans_b:
        N, Kb = b.shape
    else:
        Kb, N = b.shape
    assert K == Kb, (a.shape, b.shape, trans_b)

    if bias is None:
        bias = jnp.zeros((N,), jnp.float32)
    bias2d = bias.reshape(1, N).astype(jnp.float32)

    # Tile = full dim if the dim is small; otherwise the target (dims padded up).
    tm = M if M <= tm else tm
    tn = N if N <= tn else tn
    tk = K if K <= tk else tk
    Mp = pl.cdiv(M, tm) * tm
    Np = pl.cdiv(N, tn) * tn
    Kp = pl.cdiv(K, tk) * tk

    a_p = _pad_axis(_pad_axis(a, 0, Mp), 1, Kp)
    if trans_b:
        b_p = _pad_axis(_pad_axis(b, 0, Np), 1, Kp)
        b_spec = pl.BlockSpec((tn, tk), lambda i, j, k: (j, k))
    else:
        b_p = _pad_axis(_pad_axis(b, 0, Kp), 1, Np)
        b_spec = pl.BlockSpec((tk, tn), lambda i, j, k: (k, j))
    bias_p = _pad_axis(bias2d, 1, Np)

    grid = (Mp // tm, Np // tn, Kp // tk)

    out = pl.pallas_call(
        functools.partial(_matmul_bias_kernel, trans_rhs=trans_b),
        out_shape=jax.ShapeDtypeStruct((Mp, Np), out_dtype),
        grid_spec=pltpu.PrefetchScalarGridSpec(
            num_scalar_prefetch=0,
            grid=grid,
            in_specs=[
                pl.BlockSpec((tm, tk), lambda i, j, k: (i, k)),   # A tile
                b_spec,                                           # B tile
                pl.BlockSpec((1, tn), lambda i, j, k: (0, j)),    # bias tile
            ],
            out_specs=pl.BlockSpec((tm, tn), lambda i, j, k: (i, j)),
            scratch_shapes=[pltpu.VMEM((tm, tn), jnp.float32)],
        ),
        compiler_params=pltpu.CompilerParams(
            dimension_semantics=("parallel", "parallel", "arbitrary"),
            vmem_limit_bytes=48 * 1024 * 1024,
        ),
    )(a_p, b_p, bias_p)

    if (Mp, Np) != (M, N):
        out = out[:M, :N]
    return out


# ----------------------------------------------------------------------------
# GCN_C module (parameters + forward glue; all heavy math in the Pallas kernel)
# ----------------------------------------------------------------------------
class GCN_C:
    """JAX/Pallas port of GCN_C.  Inference semantics: dropout layers = identity."""

    def __init__(self, in_channels, hidden_channels, out_channels, num_layers,
                 dropout, dropout_adj, sparse, *, key):
        self.dropout = dropout
        self.dropout_adj_p = dropout_adj
        self.sparse = sparse
        if sparse:
            dims = ([(in_channels, hidden_channels)]
                    + [(hidden_channels, hidden_channels)] * (num_layers - 2)
                    + [(hidden_channels, out_channels)])
        else:
            dims = [(in_channels, hidden_channels)]
        self.params = []
        for din, dout in dims:
            key, kw, kb = jax.random.split(key, 3)
            bound = 1.0 / np.sqrt(din)  # nn.Linear default init
            w = jax.random.uniform(kw, (dout, din), minval=-bound, maxval=bound,
                                   dtype=jnp.float32)
            b = jax.random.uniform(kb, (dout,), minval=-bound, maxval=bound,
                                   dtype=jnp.float32)
            self.params.append((w, b))

    def __call__(self, x, adj, training=False):
        # TODO(synk): training-mode dropout on Adj / edge weights (would need a
        # pltpu.prng_* kernel); at inference nn.Dropout / F.dropout are identity.
        del training
        # Reference-module quirk: only layers[:-1] are applied in forward().
        # In the dense (sparse=False) config that slice is empty -> x is returned as-is.
        for w, b in self.params[:-1]:
            h = matmul_bias(x, w, b, trans_b=True)   # GCNConv linear: x @ W^T + b
            x = matmul_bias(adj, h)                  # aggregation:     Adj_w @ h
        return x


# ----------------------------------------------------------------------------
# Pure-JAX reference (for verification)
# ----------------------------------------------------------------------------
def gcn_c_reference(x, adj, params):
    for w, b in params[:-1]:
        x = adj @ (x @ w.T + b)
    return x


if __name__ == "__main__":
    # Small deterministic example: 512 nodes, 128 -> 64 -> 32 channels, 3 layers.
    N_NODES, IN_C, HID_C, OUT_C, NUM_LAYERS = 512, 128, 64, 32, 3
    key = jax.random.PRNGKey(0)
    k_x, k_mask, k_w, k_params = jax.random.split(key, 4)

    x = jax.random.normal(k_x, (N_NODES, IN_C), dtype=jnp.float32)

    # Dense weighted adjacency: adj[v, u] = weight of edge u -> v (0 if no edge),
    # self-loops included (plays the role of the DGL graph's edata['w']).
    mask = (jax.random.uniform(k_mask, (N_NODES, N_NODES)) < 0.05).astype(jnp.float32)
    mask = jnp.maximum(mask, jnp.eye(N_NODES, dtype=jnp.float32))
    wts = jax.random.uniform(k_w, (N_NODES, N_NODES), minval=0.1, maxval=1.0,
                             dtype=jnp.float32)
    adj = mask * wts

    # sparse=True path: layers[:-1] == first (num_layers-1) graph convs are applied.
    model = GCN_C(IN_C, HID_C, OUT_C, NUM_LAYERS, dropout=0.5, dropout_adj=0.25,
                  sparse=True, key=k_params)
    out = jax.block_until_ready(model(x, adj))
    assert out.shape == (N_NODES, HID_C)

    ref = gcn_c_reference(x, adj, model.params)
    np.testing.assert_allclose(np.asarray(out), np.asarray(ref), rtol=1e-4, atol=1e-3)

    # sparse=False (dense) configuration: layers[:-1] is empty -> forward returns x.
    model_dense = GCN_C(IN_C, HID_C, OUT_C, NUM_LAYERS, dropout=0.5, dropout_adj=0.25,
                        sparse=False, key=k_params)
    out_dense = jax.block_until_ready(model_dense(x, adj))
    np.testing.assert_allclose(np.asarray(out_dense), np.asarray(x))

    print("KERNEL_OK")
</pallas_src>

<mosaic_0001>
module attributes {stable_mosaic.version = 11 : i64} {
  func.func @_matmul_bias_kernel(%arg0: i32, %arg1: i32, %arg2: i32, %arg3: memref<256x128xf32, #tpu.memory_space<vmem>>, %arg4: memref<64x128xf32, #tpu.memory_space<vmem>>, %arg5: memref<1x64xf32, #tpu.memory_space<vmem>>, %arg6: memref<256x64xf32, #tpu.memory_space<vmem>>, %arg7: memref<256x64xf32, #tpu.memory_space<vmem>>) attributes {dimension_semantics = [#tpu.dimension_semantics<parallel>, #tpu.dimension_semantics<parallel>, #tpu.dimension_semantics<arbitrary>], iteration_bounds = array<i64: 2, 1, 1>, scalar_prefetch = 0 : i64, scratch_operands = 1 : i64, tpu.core_type = #tpu.core_type<tc>, window_params = [{transform_indices = @transform_0, window_bounds = array<i64: 256, 128>}, {transform_indices = @transform_1, window_bounds = array<i64: 64, 128>}, {transform_indices = @transform_2, window_bounds = array<i64: 1, 64>}, {transform_indices = @transform_3, window_bounds = array<i64: 256, 64>}]} {
    %c0_i32 = arith.constant 0 : i32
    %0 = arith.cmpi eq, %arg2, %c0_i32 : i32
    %1 = arith.extui %0 : i1 to i32
    %c0_i32_0 = arith.constant 0 : i32
    %2 = arith.cmpi ne, %1, %c0_i32_0 : i32
    scf.if %2 {
      %cst_10 = arith.constant 0.000000e+00 : f32
      %12 = vector.broadcast %cst_10 : f32 to vector<256x64xf32>
      %c0_11 = arith.constant 0 : index
      %c0_12 = arith.constant 0 : index
      %13 = vector.load %arg7[%c0_11, %c0_12] : memref<256x64xf32, #tpu.memory_space<vmem>>, vector<256x64xf32>
      tpu.vector_store %arg7[%c0_11, %c0_12], %12 {strides = array<i32>} : memref<256x64xf32, #tpu.memory_space<vmem>>, vector<256x64xf32>,
    } else {
    }
    %c0 = arith.constant 0 : index
    %c0_1 = arith.constant 0 : index
    %3 = vector.load %arg7[%c0, %c0_1] : memref<256x64xf32, #tpu.memory_space<vmem>>, vector<256x64xf32>
    %c0_2 = arith.constant 0 : index
    %c0_3 = arith.constant 0 : index
    %4 = vector.load %arg3[%c0_2, %c0_3] : memref<256x128xf32, #tpu.memory_space<vmem>>, vector<256x128xf32>
    %c0_4 = arith.constant 0 : index
    %c0_5 = arith.constant 0 : index
    %5 = vector.load %arg4[%c0_4, %c0_5] : memref<64x128xf32, #tpu.memory_space<vmem>>, vector<64x128xf32>
    %cst = arith.constant dense<0.000000e+00> : vector<256x64xf32>
    %6 = tpu.matmul %4, %5, %cst {dimension_numbers = #tpu.dot_dimension_numbers<[1], [1], [0], [0], [0, 0, 1, 0], [], []>} : vector<256x128xf32>, vector<64x128xf32>, vector<256x64xf32> -> vector<256x64xf32>
    %7 = arith.addf %3, %6 : vector<256x64xf32>
    %c0_6 = arith.constant 0 : index
    %c0_7 = arith.constant 0 : index
    %8 = vector.load %arg7[%c0_6, %c0_7] : memref<256x64xf32, #tpu.memory_space<vmem>>, vector<256x64xf32>
    tpu.vector_store %arg7[%c0_6, %c0_7], %7 {strides = array<i32>} : memref<256x64xf32, #tpu.memory_space<vmem>>, vector<256x64xf32>,
    %c0_i32_8 = arith.constant 0 : i32
    %9 = arith.cmpi eq, %arg2, %c0_i32_8 : i32
    %10 = arith.extui %9 : i1 to i32
    %c0_i32_9 = arith.constant 0 : i32
    %11 = arith.cmpi ne, %10, %c0_i32_9 : i32
    scf.if %11 {
      %c0_10 = arith.constant 0 : index
      %c0_11 = arith.constant 0 : index
      %12 = vector.load %arg7[%c0_10, %c0_11] : memref<256x64xf32, #tpu.memory_space<vmem>>, vector<256x64xf32>
      %c0_12 = arith.constant 0 : index
      %c0_13 = arith.constant 0 : index
      %13 = vector.load %arg5[%c0_12, %c0_13] : memref<1x64xf32, #tpu.memory_space<vmem>>, vector<1x64xf32>
      %14 = vector.broadcast %13 : vector<1x64xf32> to vector<256x64xf32>
      %15 = arith.addf %12, %14 : vector<256x64xf32>
      %c0_14 = arith.constant 0 : index
      %c0_15 = arith.constant 0 : index
      %16 = vector.load %arg6[%c0_14, %c0_15] : memref<256x64xf32, #tpu.memory_space<vmem>>, vector<256x64xf32>
      tpu.vector_store %arg6[%c0_14, %c0_15], %15 {strides = array<i32>} : memref<256x64xf32, #tpu.memory_space<vmem>>, vector<256x64xf32>,
    } else {
    }
    return
  }
  func.func @transform_0(%arg0: i32, %arg1: i32, %arg2: i32) -> (i32, i32) {
    %c0_i32 = arith.constant 0 : i32
    return %arg0, %arg2 : i32, i32
  }
  func.func @transform_1(%arg0: i32, %arg1: i32, %arg2: i32) -> (i32, i32) {
    %c0_i32 = arith.constant 0 : i32
    return %arg1, %arg2 : i32, i32
  }
  func.func @transform_2(%arg0: i32, %arg1: i32, %arg2: i32) -> (i32, i32) {
    %c0_i32 = arith.constant 0 : i32
    %c0_i32_0 = arith.constant 0 : i32
    return %c0_i32, %arg1 : i32, i32
  }
  func.func @transform_3(%arg0: i32, %arg1: i32, %arg2: i32) -> (i32, i32) {
    %c0_i32 = arith.constant 0 : i32
    return %arg0, %arg1 : i32, i32
  }
}

</mosaic_0001>

<bundles_post_ra>
// kernel: tpu_custom_call.1
= control target key start
LH: loop header
LB: loop body
LE: loop exit
PB: predicated region body
PF: predicated region fallthrough
CT: control target
= control target key end

     0   :  { %8 = vsyncpa [#allocation4], 0  ;;  %s1607_s0 = inlined_call_operand.hbm [shape: f32[512,128], index: 0, kind: input, shape index: {}]   ;;  %s1608_s1 = inlined_call_operand.hbm [shape: f32[64,128], index: 1, kind: input, shape index: {}]   ;;  %s1609_s2 = inlined_call_operand.vmem [shape: f32[1,64], index: 2, kind: input, shape index: {}]   ;;  %s1610_s3 = inlined_call_operand.vmem [shape: f32[512,64], index: 3, kind: output, shape index: {}]  }
   0x1   :  { %10 = vsyncpa [#allocation4 + $0x1], 0 }
   0x2   :  { %11 = vsyncpa [#allocation6], 0  ;;  %s1240_s12 = smov 0   ;;  %s1242_s13 = smov 0  }
   0x3   :  { %s1244_s14 = smov 0   ;;  %s1246_s15 = smov 0  }
   0x4   :  { %s1248_s16 = smov 0   ;;  %s1250_s17 = smov 0  }
   0x5 LB: > { %s886_s18 = sadd.s32 4294967295, %s1213_s17   ;;  %p58_p0 = scmp.ne.s32.totalorder %s1197_s13, %s1193_s12  ;;  %s1213_s17 = sphi %s1250_s17, %s17_s17   ;;  %s1209_s16 = sphi %s1248_s16, %s1627_s16   ;;  %s1205_s15 = sphi %s1246_s15, %s1626_s15   ;;  %s1201_s14 = sphi %s1244_s14, %s1625_s14   ;;  %s1197_s13 = sphi %s1242_s13, %s1624_s13   ;;  %s1193_s12 = sphi %s1240_s12, %s1623_s12  }
   0x6   : > { %p1270_p1 = scmp.eq.s32.totalorder %s886_s18, 0  ;;  %p888_p2 = scmp.ge.s32.totalorder %s1213_s17, 1 }
   0x7   : > { %p151_p3 = scmp.lt.s32.totalorder %s1213_s17, 3  ;;  %s1215_s22 = smov [#allocation5]  }
   0x8   : > { %s1615_s19 = scalar_select %p1270_p1, 1, 0 }
   0x9   : > { %p1278_p4 = por %p1270_p1, %p58_p0  ;;  %p1282_p5 = pnand %p888_p2, %p151_p3 }
   0xa   : > { %s167_s23 = sshll.u32 %s1215_s22, 4  ;;  %s36_s25 = sadd.s32 1, %s1209_s16  ;;  %s168_s23 = int_to_ptr.vmem [resolvable:$true] %s167_s23 }
   0xb   : > { %s1616_s20 = scalar_select %p1278_p4, 1, 0 }
   0xc   : > { %s1617_s21 = scalar_select %p1282_p5, 1, 0 }
   0xd   : > { %p1038_p6 = pneg %p1282_p5  ;;  %s1101_s28 = scalar_lea.hbm %s1608_s1, 1024 }
   0xe   : > { %p1102_p8 = scmp.ne.s32.totalorder %s1608_s1, %s1101_s28  ;;  %p1108_p12 = scmp.lt.u32.totalorder %s1101_s28, %s1608_s1 }
   0xf   : > { %p1290_p7 = pnand %p1038_p6, %p1270_p1 }
  0x11   : > { %p1103_p9 = pneg %p1290_p7 }
  0x13   : > { %p1104_p10 = pnand %p1103_p9, %p1102_p8 }
  0x15   : > { %p1105_p11 = pneg %p1104_p10 }
  0x17   : > { %p1110_p13 = pnand %p1108_p12, %p1105_p11 }
  0x19   : > { %1113 = shalt.err (!%p1110_p13)
}
  0x1a   : > { %s1114_s6 = scalar_lea.vmem %s168_s23, 1024  ;;  %p1122_p6 = scmp.lt.s32.totalorder %s168_s23, %s168_s23 }
  0x1b   : > { %p1115_p0 = scmp.ne.s32.totalorder %s168_s23, %s1114_s6  ;;  %p1123_p1 = scmp.lt.s32.totalorder %s1114_s6, %s1114_s6 }
  0x1d   : > { %p1117_p2 = pnand %p1115_p0, %p1103_p9  ;;  %p1124_p4 = por %p1123_p1, %p1122_p6 }
  0x1f   : > { %p1118_p3 = pneg %p1117_p2 }
  0x21   : > { %p1125_p5 = pnand %p1124_p4, %p1118_p3 }
  0x23   : > { %1128 = shalt.err (!%p1125_p5)
}
  0x24   : > { %s1216_s7 = smov 128   ;;  %s1217_s8 = smov 8  }
  0x25   : > { %1041 = dma.hbm_to_vmem [thread:$0]  (!%p1290_p7), %s1608_s1, 1024, %s168_s23, [#allocation6], %s1216_s7, %s1216_s7, %s1217_s8  }
  0x26   : > { %p38_p1 = scmp.ge.s32.totalorder %s36_s25, 2  ;;  %s45_s11 = sadd.s32 1, %s1201_s14 }
  0x27   : > { %p52_p4 = scmp.ne.s32.totalorder %s1201_s14, %s1197_s13  ;;  %p53_p5 = scmp.eq.s32.totalorder %s1213_s17, 0 }
  0x28   : > { %s1629_s25 = smov (%p38_p1, %s36_s25), 0  ;;  %p1047_p9 = scmp.lt.s32.totalorder %s1213_s17, 2 }
  0x29   : > { %p54_p8 = por %p53_p5, %p52_p4  ;;  %s40_s12 = ssub.s32 %s1209_s16, %s1629_s25 }
  0x2a   : > { %s187_s18 = sand.u32 1, %s1201_s14   ;;  %p43_p10 = scmp.eq.s32.totalorder %s40_s12, 0 }
  0x2b   : > { %s892_s22 = sshll.u32 %s187_s18, 8  ;;  %s903_s24 = sshll.u32 %s1209_s16, 12 }
  0x2c   : > { %s1326_s26 = scalar_select %p43_p10, %s1201_s14, %s45_s11  }
  0x2d   : > { %s1331_s23 = scalar_lea.hbm %s1607_s0, %s903_s24  ;;  %s191_s29 = scalar_lea.vmem [#allocation3], %s892_s22 }
  0x2e   : > { %s199_s30 = sshll.u32 %s191_s29, 4  ;;  %p1333_p7 = pnand %p1047_p9, %p54_p8  ;;  %s1337_s30 = int_to_ptr.vmem [resolvable:$true] %s199_s30 }
  0x2f   : > { %s1339_s5 = scalar_lea.sflag [#allocation4], %s187_s18  ;;  %s1129_s6 = scalar_lea.hbm %s1331_s23, 4096 }
  0x30   : > { %p1130_p11 = scmp.ne.s32.totalorder %s1331_s23, %s1129_s6  ;;  %p1131_p12 = pneg %p1333_p7 }
  0x31   : > { %s1134_s11 = scalar_lea.hbm %s1607_s0, 8192  ;;  %p1135_p2 = scmp.lt.u32.totalorder %s1331_s23, %s1607_s0 }
  0x32   : > { %p1132_p13 = pnand %p1131_p12, %p1130_p11  ;;  %p1136_p3 = scmp.lt.u32.totalorder %s1134_s11, %s1129_s6 }
  0x33   : > { %p1138_p1 = scmp.lt.u32.totalorder %s1129_s6, %s1331_s23 }
  0x34   : > { %p1133_p0 = pneg %p1132_p13  ;;  %p1137_p6 = por %p1136_p3, %p1135_p2 }
  0x36   : > { %p1139_p4 = por %p1138_p1, %p1137_p6 }
  0x38   : > { %p1140_p5 = pnand %p1139_p4, %p1133_p0 }
  0x3a   : > { %1143 = shalt.err (!%p1140_p5)
}
  0x3b   : > { %s1144_s18 = scalar_lea.vmem %s1337_s30, 4096  ;;  %s1218_s24 = smov [#allocation3]  }
  0x3c   : > { %p1145_p8 = scmp.ne.s32.totalorder %s1337_s30, %s1144_s18  ;;  %s1149_s27 = sshll.u32 %s1218_s24, 4  ;;  %s1150_s27 = int_to_ptr.vmem [resolvable:$false] %s1149_s27 }
  0x3d   : > { %s1151_s28 = scalar_lea.vmem %s1150_s27, 8192  ;;  %p1152_p11 = scmp.lt.s32.totalorder %s1337_s30, %s1150_s27 }
  0x3e   : > { %p1147_p9 = pnand %p1145_p8, %p1131_p12  ;;  %p1153_p13 = scmp.lt.s32.totalorder %s1151_s28, %s1144_s18 }
  0x40   : > { %p1148_p10 = pneg %p1147_p9  ;;  %p1154_p2 = por %p1153_p13, %p1152_p11 }
  0x42   : > { %p1155_p3 = pnand %p1154_p2, %p1148_p10 }
  0x44   : > { %1158 = shalt.err (!%p1155_p3)
}
  0x45   : > { %1045 = dma.hbm_to_vmem [thread:$0]  (!%p1333_p7), %s1331_s23, 4096, %s1337_s30, %s1339_s5, %s1216_s7, %s1216_s7, %s1217_s8  }
  0x46   : > { %p1620_p12 = scmp.ne.s32.totalorder %s1617_s21, 0 }
  0x47   : > { %s213_s29 = sand.u32 (!%p1620_p12), 1, %s1197_s13   ;;  %p1621_p0 = scmp.ne.s32.totalorder (!%p1620_p12), %s1616_s20, 0 }
  0x48   : > { %211 = sbr.rel (%p1620_p12) target bundleno = 373 (0x175), region = 32  ;;  %s896_s6 = sshll.u32 (!%p1620_p12), %s213_s29, 8 }
  0x49   : > { %s214_s9 = scalar_lea.sflag (!%p1620_p12), [#allocation4], %s213_s29  ;;  %s1373_s10 = scalar_lea.vmem (!%p1620_p12), [#allocation3], %s896_s6 }
  0x4f   : > { %1184 = dma.done.wait (%p1621_p0), %s214_s9, 4096  }
  0x50   : > { %1186 = vsyncadd (%p1621_p0), %s214_s9, 4294963200  ;;  %p1622_p6 = scmp.ne.s32.totalorder %s1615_s19, 0 }
  0x52   : > { %1188 = dma.done.wait (%p1622_p6), [#allocation6], 1024  }
  0x53   : > { %1190 = vsyncadd (%p1622_p6), [#allocation6], 4294966272  ;;  %vm268_vm0 = vcmask 523264   ;;  %v1219_v0 = vmov 0.0   ;;  %v365_v1 = vld [vmem:[#allocation5] sm:$0xff]  ;;  %v366_v2 = vld [vmem:[#allocation5 + $0x8] sm:$0xff] }
  0x54   : > { %270 = vst.msk [vmem:[#allocation2 + $0x8] sm:$0xff] %vm268_vm0, %v1219_v0  ;;  %269 = vst.msk [vmem:[#allocation2] sm:$0xff] %vm268_vm0, %v1219_v0  ;;  %v367_v3 = vld [vmem:[#allocation5 + $0x10] sm:$0xff]  ;;  %v1008_v4 = vpack.c.bf16 %v366_v2, %v365_v1  ;;  %v368_v5 = vld [vmem:[#allocation5 + $0x18] sm:$0xff]  ;;  %s898_s19 = sshll.u32 %s1205_s15, 5 }
  0x55   : > { %271 = vst.msk [vmem:[#allocation2 + $0x10] sm:$0xff] %vm268_vm0, %v1219_v0  ;;  %272 = vst.msk [vmem:[#allocation2 + $0x18] sm:$0xff] %vm268_vm0, %v1219_v0  ;;  %v1012_v6 = vpack.c.bf16 %v368_v5, %v367_v3  ;;  %v333_v7 = vld [vmem:[%s1373_s10] sm:$0xff]  ;;  %v370_v10 = vld [vmem:[#allocation5 + $0x28] sm:$0xff]  ;;  %p256_p7 = scmp.lt.s32.totalorder %s898_s19, 63 }
  0x56   : > { %273 = vst.msk [vmem:[#allocation2 + $0x20] sm:$0xff] %vm268_vm0, %v1219_v0  ;;  %274 = vst.msk [vmem:[#allocation2 + $0x28] sm:$0xff] %vm268_vm0, %v1219_v0  ;;  %1009 = vmatprep.subr.bf16.mxu0 %v1008_v4  ;;  %1024 = vmatprep.subr.bf16.mxu1 %v1008_v4  ;;  %v349_v8 = vld [vmem:[%s1373_s10 + $0x80] sm:$0xff]  ;;  %v371_v12 = vld [vmem:[#allocation5 + $0x30] sm:$0xff] }
  0x57   : > { %275 = vst.msk [vmem:[#allocation2 + $0x30] sm:$0xff] %vm268_vm0, %v1219_v0  ;;  %276 = vst.msk [vmem:[#allocation2 + $0x38] sm:$0xff] %vm268_vm0, %v1219_v0  ;;  %1011 = vmatpush3.bf16.xpose.msra.mxu0 %v1008_v4  ;;  %1028 = vmatpush3.bf16.xpose.msra.mxu1 %v1008_v4  ;;  %v369_v9 = vld [vmem:[#allocation5 + $0x20] sm:$0xff]  ;;  %v372_v13 = vld [vmem:[#allocation5 + $0x38] sm:$0xff]  ;;  %s1631_s19 = smov (!%p256_p7, %s898_s19), 63 }
  0x58   : > { %277 = vst.msk [vmem:[#allocation2 + $0x40] sm:$0xff] %vm268_vm0, %v1219_v0  ;;  %278 = vst.msk [vmem:[#allocation2 + $0x48] sm:$0xff] %vm268_vm0, %v1219_v0  ;;  %1013 = vmatprep.subr.bf16.mxu0 %v1012_v6  ;;  %1025 = vmatprep.subr.bf16.mxu1 %v1012_v6  ;;  %v1016_v11 = vpack.c.bf16 %v370_v10, %v369_v9  ;;  %v1020_v14 = vpack.c.bf16 %v372_v13, %v371_v12  ;;  %v334_v15 = vld [vmem:[%s1373_s10 + $0x8] sm:$0xff]  ;;  %v335_v17 = vld [vmem:[%s1373_s10 + $0x10] sm:$0xff]  ;;  %s899_s15 = sshll.u32 %s1631_s19, 3 }
  0x59   : > { %279 = vst.msk [vmem:[#allocation2 + $0x50] sm:$0xff] %vm268_vm0, %v1219_v0  ;;  %280 = vst.msk [vmem:[#allocation2 + $0x58] sm:$0xff] %vm268_vm0, %v1219_v0  ;;  %960 = vmatprep.mubr.f32.mxu0 %v333_v7  ;;  %984 = vmatprep.mubr.f32.mxu1 %v349_v8  ;;  %v350_v16 = vld [vmem:[%s1373_s10 + $0x88] sm:$0xff]  ;;  %v351_v18 = vld [vmem:[%s1373_s10 + $0x90] sm:$0xff]  ;;  %s1467_s23 = scalar_lea.vmem %s1610_s3, %s899_s15 }
  0x5a   : > { %281 = vst.msk [vmem:[#allocation2 + $0x60] sm:$0xff] %vm268_vm0, %v1219_v0  ;;  %282 = vst.msk [vmem:[#allocation2 + $0x68] sm:$0xff] %vm268_vm0, %v1219_v0  ;;  %v336_v19 = vld [vmem:[%s1373_s10 + $0x18] sm:$0xff]  ;;  %v337_v21 = vld [vmem:[%s1373_s10 + $0x20] sm:$0xff] }
  0x5b   : > { %283 = vst.msk [vmem:[#allocation2 + $0x70] sm:$0xff] %vm268_vm0, %v1219_v0  ;;  %284 = vst.msk [vmem:[#allocation2 + $0x78] sm:$0xff] %vm268_vm0, %v1219_v0  ;;  %v352_v20 = vld [vmem:[%s1373_s10 + $0x98] sm:$0xff]  ;;  %v353_v22 = vld [vmem:[%s1373_s10 + $0xa0] sm:$0xff] }
  0x5c   : > { %285 = vst.msk [vmem:[#allocation2 + $0x80] sm:$0xff] %vm268_vm0, %v1219_v0  ;;  %286 = vst.msk [vmem:[#allocation2 + $0x88] sm:$0xff] %vm268_vm0, %v1219_v0  ;;  %v338_v23 = vld [vmem:[%s1373_s10 + $0x28] sm:$0xff]  ;;  %v339_v25 = vld [vmem:[%s1373_s10 + $0x30] sm:$0xff] }
  0x5d   : > { %287 = vst.msk [vmem:[#allocation2 + $0x90] sm:$0xff] %vm268_vm0, %v1219_v0  ;;  %288 = vst.msk [vmem:[#allocation2 + $0x98] sm:$0xff] %vm268_vm0, %v1219_v0  ;;  %v354_v24 = vld [vmem:[%s1373_s10 + $0xa8] sm:$0xff]  ;;  %v355_v26 = vld [vmem:[%s1373_s10 + $0xb0] sm:$0xff] }
  0x5e   : > { %289 = vst.msk [vmem:[#allocation2 + $0xa0] sm:$0xff] %vm268_vm0, %v1219_v0  ;;  %290 = vst.msk [vmem:[#allocation2 + $0xa8] sm:$0xff] %vm268_vm0, %v1219_v0  ;;  %v340_v27 = vld [vmem:[%s1373_s10 + $0x38] sm:$0xff]  ;;  %v341_v29 = vld [vmem:[%s1373_s10 + $0x40] sm:$0xff] }
  0x5f   : > { %291 = vst.msk [vmem:[#allocation2 + $0xb0] sm:$0xff] %vm268_vm0, %v1219_v0  ;;  %292 = vst.msk [vmem:[#allocation2 + $0xb8] sm:$0xff] %vm268_vm0, %v1219_v0  ;;  %1015 = vmatpush3.bf16.xpose.msra.mxu0 %v1012_v6  ;;  %1029 = vmatpush3.bf16.xpose.msra.mxu1 %v1012_v6  ;;  %v356_v28 = vld [vmem:[%s1373_s10 + $0xb8] sm:$0xff]  ;;  %v357_v30 = vld [vmem:[%s1373_s10 + $0xc0] sm:$0xff] }
  0x60   : > { %293 = vst.msk [vmem:[#allocation2 + $0xc0] sm:$0xff] %vm268_vm0, %v1219_v0  ;;  %294 = vst.msk [vmem:[#allocation2 + $0xc8] sm:$0xff] %vm268_vm0, %v1219_v0  ;;  %1017 = vmatprep.subr.bf16.mxu0 %v1016_v11  ;;  %1026 = vmatprep.subr.bf16.mxu1 %v1016_v11  ;;  %v342_v31 = vld [vmem:[%s1373_s10 + $0x48] sm:$0xff]  ;;  %v343_v33 = vld [vmem:[%s1373_s10 + $0x50] sm:$0xff] }
  0x61   : > { %295 = vst.msk [vmem:[#allocation2 + $0xd0] sm:$0xff] %vm268_vm0, %v1219_v0  ;;  %296 = vst.msk [vmem:[#allocation2 + $0xd8] sm:$0xff] %vm268_vm0, %v1219_v0  ;;  %v358_v32 = vld [vmem:[%s1373_s10 + $0xc8] sm:$0xff]  ;;  %v359_v34 = vld [vmem:[%s1373_s10 + $0xd0] sm:$0xff] }
  0x62   : > { %297 = vst.msk [vmem:[#allocation2 + $0xe0] sm:$0xff] %vm268_vm0, %v1219_v0  ;;  %298 = vst.msk [vmem:[#allocation2 + $0xe8] sm:$0xff] %vm268_vm0, %v1219_v0  ;;  %v344_v35 = vld [vmem:[%s1373_s10 + $0x58] sm:$0xff]  ;;  %v345_v37 = vld [vmem:[%s1373_s10 + $0x60] sm:$0xff] }
  0x63   : > { %299 = vst.msk [vmem:[#allocation2 + $0xf0] sm:$0xff] %vm268_vm0, %v1219_v0  ;;  %300 = vst.msk [vmem:[#allocation2 + $0xf8] sm:$0xff] %vm268_vm0, %v1219_v0  ;;  %v360_v36 = vld [vmem:[%s1373_s10 + $0xd8] sm:$0xff]  ;;  %v361_v38 = vld [vmem:[%s1373_s10 + $0xe0] sm:$0xff] }
  0x64   : > { %v346_v39 = vld [vmem:[%s1373_s10 + $0x68] sm:$0xff]  ;;  %v347_v41 = vld [vmem:[%s1373_s10 + $0x70] sm:$0xff]  ;;  %v348_v43 = vld [vmem:[%s1373_s10 + $0x78] sm:$0xff] }
  0x65   : > { %v362_v40 = vld [vmem:[%s1373_s10 + $0xe8] sm:$0xff]  ;;  %v363_v42 = vld [vmem:[%s1373_s10 + $0xf0] sm:$0xff]  ;;  %v364_v44 = vld [vmem:[%s1373_s10 + $0xf8] sm:$0xff] }
  0x66   : > { %v302_v45 = vld [vmem:[#allocation2 + $0x8] sm:$0xff]  ;;  %v301_v47 = vld [vmem:[#allocation2] sm:$0xff]  ;;  %v304_v57 = vld [vmem:[#allocation2 + $0x18] sm:$0xff] }
  0x67   : > { %1019 = vmatpush3.bf16.xpose.msra.mxu0 %v1016_v11  ;;  %1030 = vmatpush3.bf16.xpose.msra.mxu1 %v1016_v11  ;;  %v318_v46 = vld [vmem:[#allocation2 + $0x88] sm:$0xff]  ;;  %v317_v48 = vld [vmem:[#allocation2 + $0x80] sm:$0xff]  ;;  %v320_v58 = vld [vmem:[#allocation2 + $0x98] sm:$0xff] }
  0x68   : > { %1021 = vmatprep.subr.bf16.mxu0 %v1020_v14  ;;  %1027 = vmatprep.subr.bf16.mxu1 %v1020_v14  ;;  %v303_v59 = vld [vmem:[#allocation2 + $0x10] sm:$0xff]  ;;  %v306_v5 = vld [vmem:[#allocation2 + $0x28] sm:$0xff]  ;;  %v305_v7 = vld [vmem:[#allocation2 + $0x20] sm:$0xff] }
  0x69   : > { %v319_v60 = vld [vmem:[#allocation2 + $0x90] sm:$0xff]  ;;  %v322_v6 = vld [vmem:[#allocation2 + $0xa8] sm:$0xff]  ;;  %v321_v8 = vld [vmem:[#allocation2 + $0xa0] sm:$0xff] }
  0x6a   : > { %v1460_v9 = vld [vmem:[%s1609_s2] ss:$0 sm:$0xff] }
  0x6f   : > { %1023 = vmatpush3.bf16.xpose.msra.mxu0 %v1020_v14  ;;  %1031 = vmatpush3.bf16.xpose.msra.mxu1 %v1020_v14 }
  0x76   : > { %961 = vmatmul.mubr.f32.vlgmr.msra.gmra.mrb[0].mxu0 %v334_v15  ;;  %985 = vmatmul.mubr.f32.vlgmr.msra.gmra.mrb[0].mxu1 %v350_v16  ;;  %v308_v16 = vld [vmem:[#allocation2 + $0x38] sm:$0xff] }
  0x77   : > { %963 = vmatprep.mubr.f32.mxu0 %v335_v17  ;;  %987 = vmatprep.mubr.f32.mxu1 %v351_v18  ;;  %v324_v17 = vld [vmem:[#allocation2 + $0xb8] sm:$0xff] }
  0x7a   : > { %964 = vmatmul.mubr.f32.gmra.mrb[2].mxu0 %v336_v19  ;;  %988 = vmatmul.mubr.f32.gmra.mrb[2].mxu1 %v352_v20 }
  0x7b   : > { %966 = vmatprep.mubr.f32.mxu0 %v337_v21  ;;  %990 = vmatprep.mubr.f32.mxu1 %v353_v22  ;;  %v307_v22 = vld [vmem:[#allocation2 + $0x30] sm:$0xff] }
  0x7e   : > { %967 = vmatmul.mubr.f32.gmra.mrb[4].mxu0 %v338_v23  ;;  %991 = vmatmul.mubr.f32.gmra.mrb[4].mxu1 %v354_v24 }
  0x7f   : > { %969 = vmatprep.mubr.f32.mxu0 %v339_v25  ;;  %993 = vmatprep.mubr.f32.mxu1 %v355_v26 }
  0x82   : > { %970 = vmatmul.mubr.f32.gmra.mrb[6].mxu0 %v340_v27  ;;  %994 = vmatmul.mubr.f32.gmra.mrb[6].mxu1 %v356_v28  ;;  %v323_v27 = vld [vmem:[#allocation2 + $0xb0] sm:$0xff] }
  0x83   : > { %972 = vmatprep.mubr.f32.mxu0 %v341_v29  ;;  %996 = vmatprep.mubr.f32.mxu1 %v357_v30 }
  0x86   : > { %973 = vmatmul.mubr.f32.gmra.mrb[8].mxu0 %v342_v31  ;;  %997 = vmatmul.mubr.f32.gmra.mrb[8].mxu1 %v358_v32 }
  0x87   : > { %975 = vmatprep.mubr.f32.mxu0 %v343_v33  ;;  %999 = vmatprep.mubr.f32.mxu1 %v359_v34 }
  0x8a   : > { %976 = vmatmul.mubr.f32.gmra.mrb[10].mxu0 %v344_v35  ;;  %1000 = vmatmul.mubr.f32.gmra.mrb[10].mxu1 %v360_v36  ;;  %v310_v36 = vld [vmem:[#allocation2 + $0x48] sm:$0xff] }
  0x8b   : > { %978 = vmatprep.mubr.f32.mxu0 %v345_v37  ;;  %1002 = vmatprep.mubr.f32.mxu1 %v361_v38  ;;  %v326_v37 = vld [vmem:[#allocation2 + $0xc8] sm:$0xff] }
  0x8e   : > { %979 = vmatmul.mubr.f32.gmra.mrb[12].mxu0 %v346_v39  ;;  %1003 = vmatmul.mubr.f32.gmra.mrb[12].mxu1 %v362_v40 }
  0x8f   : > { %981 = vmatprep.mubr.f32.mxu0 %v347_v41  ;;  %1005 = vmatprep.mubr.f32.mxu1 %v363_v42  ;;  %v309_v42 = vld [vmem:[#allocation2 + $0x40] sm:$0xff] }
  0x92   : > { %982 = vmatmul.mubr.f32.gmra.mrb[14].mxu0 %v348_v43  ;;  %1006 = vmatmul.mubr.f32.gmra.mrb[14].mxu1 %v364_v44 }
 0x149   : > { %v962_v49 = vpop.f32.mrb[0].mxu0  ;;  %v986_v50 = vpop.f32.mrb[0].mxu1 }
 0x14a   : > { %v599_v51 = vadd.f32 %v962_v49, %v302_v45  ;;  %v615_v52 = vadd.f32 %v986_v50, %v318_v46  ;;  %v439_v53 = vpop.f32.mrb[1].mxu0  ;;  %v519_v54 = vpop.f32.mrb[1].mxu1 }
 0x14b   : > { %v598_v55 = vadd.f32 %v439_v53, %v301_v47  ;;  %v614_v56 = vadd.f32 %v519_v54, %v317_v48  ;;  %v325_v47 = vld [vmem:[#allocation2 + $0xc0] sm:$0xff] }
 0x14c   : > { %632 = vst.msk [vmem:[#allocation2 + $0x8] sm:$0xff] %vm268_vm0, %v599_v51  ;;  %648 = vst.msk [vmem:[#allocation2 + $0x88] sm:$0xff] %vm268_vm0, %v615_v52 }
 0x14d   : > { %631 = vst.msk [vmem:[#allocation2] sm:$0xff] %vm268_vm0, %v598_v55  ;;  %647 = vst.msk [vmem:[#allocation2 + $0x80] sm:$0xff] %vm268_vm0, %v614_v56  ;;  %v965_v61 = vpop.f32.mrb[2].mxu0  ;;  %v989_v62 = vpop.f32.mrb[2].mxu1  ;;  %v312_v56 = vld [vmem:[#allocation2 + $0x58] sm:$0xff] }
 0x14e   : > { %v601_v63 = vadd.f32 %v965_v61, %v304_v57  ;;  %v617_v0 = vadd.f32 %v989_v62, %v320_v58  ;;  %v449_v1 = vpop.f32.mrb[3].mxu0  ;;  %v529_v2 = vpop.f32.mrb[3].mxu1  ;;  %v328_v57 = vld [vmem:[#allocation2 + $0xd8] sm:$0xff]  ;;  %v311_v62 = vld [vmem:[#allocation2 + $0x50] sm:$0xff] }
 0x14f   : > { %v600_v3 = vadd.f32 %v449_v1, %v303_v59  ;;  %v616_v4 = vadd.f32 %v529_v2, %v319_v60 }
 0x150   : > { %634 = vst.msk [vmem:[#allocation2 + $0x18] sm:$0xff] %vm268_vm0, %v601_v63  ;;  %650 = vst.msk [vmem:[#allocation2 + $0x98] sm:$0xff] %vm268_vm0, %v617_v0 }
 0x151   : > { %633 = vst.msk [vmem:[#allocation2 + $0x10] sm:$0xff] %vm268_vm0, %v600_v3  ;;  %649 = vst.msk [vmem:[#allocation2 + $0x90] sm:$0xff] %vm268_vm0, %v616_v4  ;;  %v968_v10 = vpop.f32.mrb[4].mxu0  ;;  %v992_v11 = vpop.f32.mrb[4].mxu1  ;;  %v327_v3 = vld [vmem:[#allocation2 + $0xd0] sm:$0xff] }
 0x152   : > { %v603_v12 = vadd.f32 %v968_v10, %v306_v5  ;;  %v619_v13 = vadd.f32 %v992_v11, %v322_v6  ;;  %v459_v14 = vpop.f32.mrb[5].mxu0  ;;  %v539_v15 = vpop.f32.mrb[5].mxu1 }
 0x153   : > { %v667_v18 = vld [vmem:[#allocation2 + $0x8] sm:$0xff]  ;;  %v602_v20 = vadd.f32 %v459_v14, %v305_v7  ;;  %v618_v21 = vadd.f32 %v539_v15, %v321_v8 }
 0x154   : > { %v683_v19 = vld [vmem:[#allocation2 + $0x88] sm:$0xff]  ;;  %v706_v23 = vadd.f32 %v1460_v9, %v667_v18  ;;  %v666_v25 = vld [vmem:[#allocation2] sm:$0xff]  ;;  %636 = vst.msk [vmem:[#allocation2 + $0x28] sm:$0xff] %vm268_vm0, %v603_v12  ;;  %652 = vst.msk [vmem:[#allocation2 + $0xa8] sm:$0xff] %vm268_vm0, %v619_v13 }
 0x155   : > { %v722_v24 = vadd.f32 %v1460_v9, %v683_v19  ;;  %v682_v26 = vld [vmem:[#allocation2 + $0x80] sm:$0xff]  ;;  %v705_v28 = vadd.f32 %v1460_v9, %v666_v25  ;;  %635 = vst.msk [vmem:[#allocation2 + $0x20] sm:$0xff] %vm268_vm0, %v602_v20  ;;  %651 = vst.msk [vmem:[#allocation2 + $0xa0] sm:$0xff] %vm268_vm0, %v618_v21  ;;  %v971_v30 = vpop.f32.mrb[6].mxu0  ;;  %v995_v31 = vpop.f32.mrb[6].mxu1  ;;  %v314_v13 = vld [vmem:[#allocation2 + $0x68] sm:$0xff] }
 0x156   : > { %v721_v29 = vadd.f32 %v1460_v9, %v682_v26  ;;  %738 = vst.msk [vmem:[%s1467_s23 + $0x8] sm:$0xff] %vm268_vm0, %v706_v23  ;;  %v605_v32 = vadd.f32 %v971_v30, %v308_v16  ;;  %v621_v33 = vadd.f32 %v995_v31, %v324_v17  ;;  %v469_v34 = vpop.f32.mrb[7].mxu0  ;;  %v549_v35 = vpop.f32.mrb[7].mxu1  ;;  %v330_v14 = vld [vmem:[#allocation2 + $0xe8] sm:$0xff]  ;;  %v313_v19 = vld [vmem:[#allocation2 + $0x60] sm:$0xff] }
 0x157   : > { %754 = vst.msk [vmem:[%s1467_s23 + $0x88] sm:$0xff] %vm268_vm0, %v722_v24  ;;  %737 = vst.msk [vmem:[%s1467_s23] sm:$0xff] %vm268_vm0, %v705_v28  ;;  %v669_v38 = vld [vmem:[#allocation2 + $0x18] sm:$0xff]  ;;  %v604_v40 = vadd.f32 %v469_v34, %v307_v22  ;;  %v620_v41 = vadd.f32 %v549_v35, %v323_v27  ;;  %v329_v24 = vld [vmem:[#allocation2 + $0xe0] sm:$0xff] }
 0x158   : > { %753 = vst.msk [vmem:[%s1467_s23 + $0x80] sm:$0xff] %vm268_vm0, %v721_v29  ;;  %v685_v39 = vld [vmem:[#allocation2 + $0x98] sm:$0xff]  ;;  %v708_v43 = vadd.f32 %v1460_v9, %v669_v38  ;;  %v668_v45 = vld [vmem:[#allocation2 + $0x10] sm:$0xff]  ;;  %638 = vst.msk [vmem:[#allocation2 + $0x38] sm:$0xff] %vm268_vm0, %v605_v32 }
 0x159   : > { %v724_v44 = vadd.f32 %v1460_v9, %v685_v39  ;;  %v684_v46 = vld [vmem:[#allocation2 + $0x90] sm:$0xff]  ;;  %654 = vst.msk [vmem:[#allocation2 + $0xb8] sm:$0xff] %vm268_vm0, %v621_v33  ;;  %v707_v48 = vadd.f32 %v1460_v9, %v668_v45  ;;  %637 = vst.msk [vmem:[#allocation2 + $0x30] sm:$0xff] %vm268_vm0, %v604_v40  ;;  %v974_v50 = vpop.f32.mrb[8].mxu0  ;;  %v998_v51 = vpop.f32.mrb[8].mxu1  ;;  %v316_v33 = vld [vmem:[#allocation2 + $0x78] sm:$0xff] }
 0x15a   : > { %v723_v49 = vadd.f32 %v1460_v9, %v684_v46  ;;  %653 = vst.msk [vmem:[#allocation2 + $0xb0] sm:$0xff] %vm268_vm0, %v620_v41  ;;  %740 = vst.msk [vmem:[%s1467_s23 + $0x18] sm:$0xff] %vm268_vm0, %v708_v43  ;;  %v607_v52 = vadd.f32 %v974_v50, %v310_v36  ;;  %v623_v53 = vadd.f32 %v998_v51, %v326_v37  ;;  %v479_v54 = vpop.f32.mrb[9].mxu0  ;;  %v559_v55 = vpop.f32.mrb[9].mxu1  ;;  %v332_v34 = vld [vmem:[#allocation2 + $0xf8] sm:$0xff]  ;;  %v315_v39 = vld [vmem:[#allocation2 + $0x70] sm:$0xff] }
 0x15b   : > { %756 = vst.msk [vmem:[%s1467_s23 + $0x98] sm:$0xff] %vm268_vm0, %v724_v44  ;;  %739 = vst.msk [vmem:[%s1467_s23 + $0x10] sm:$0xff] %vm268_vm0, %v707_v48  ;;  %v671_v58 = vld [vmem:[#allocation2 + $0x28] sm:$0xff]  ;;  %v606_v60 = vadd.f32 %v479_v54, %v309_v42  ;;  %v622_v61 = vadd.f32 %v559_v55, %v325_v47  ;;  %v331_v44 = vld [vmem:[#allocation2 + $0xf0] sm:$0xff] }
 0x15c   : > { %755 = vst.msk [vmem:[%s1467_s23 + $0x90] sm:$0xff] %vm268_vm0, %v723_v49  ;;  %v687_v59 = vld [vmem:[#allocation2 + $0xa8] sm:$0xff]  ;;  %v710_v63 = vadd.f32 %v1460_v9, %v671_v58  ;;  %v670_v1 = vld [vmem:[#allocation2 + $0x20] sm:$0xff]  ;;  %640 = vst.msk [vmem:[#allocation2 + $0x48] sm:$0xff] %vm268_vm0, %v607_v52 }
 0x15d   : > { %v726_v0 = vadd.f32 %v1460_v9, %v687_v59  ;;  %v686_v2 = vld [vmem:[#allocation2 + $0xa0] sm:$0xff]  ;;  %656 = vst.msk [vmem:[#allocation2 + $0xc8] sm:$0xff] %vm268_vm0, %v623_v53  ;;  %v709_v4 = vadd.f32 %v1460_v9, %v670_v1  ;;  %639 = vst.msk [vmem:[#allocation2 + $0x40] sm:$0xff] %vm268_vm0, %v606_v60  ;;  %v977_v6 = vpop.f32.mrb[10].mxu0  ;;  %v1001_v7 = vpop.f32.mrb[10].mxu1 }
 0x15e   : > { %v725_v5 = vadd.f32 %v1460_v9, %v686_v2  ;;  %655 = vst.msk [vmem:[#allocation2 + $0xc0] sm:$0xff] %vm268_vm0, %v622_v61  ;;  %742 = vst.msk [vmem:[%s1467_s23 + $0x28] sm:$0xff] %vm268_vm0, %v710_v63  ;;  %v609_v8 = vadd.f32 %v977_v6, %v312_v56  ;;  %v625_v10 = vadd.f32 %v1001_v7, %v328_v57  ;;  %v489_v11 = vpop.f32.mrb[11].mxu0  ;;  %v569_v12 = vpop.f32.mrb[11].mxu1 }
 0x15f   : > { %758 = vst.msk [vmem:[%s1467_s23 + $0xa8] sm:$0xff] %vm268_vm0, %v726_v0  ;;  %741 = vst.msk [vmem:[%s1467_s23 + $0x20] sm:$0xff] %vm268_vm0, %v709_v4  ;;  %v673_v15 = vld [vmem:[#allocation2 + $0x38] sm:$0xff]  ;;  %v608_v17 = vadd.f32 %v489_v11, %v311_v62  ;;  %v624_v18 = vadd.f32 %v569_v12, %v327_v3 }
 0x160   : > { %757 = vst.msk [vmem:[%s1467_s23 + $0xa0] sm:$0xff] %vm268_vm0, %v725_v5  ;;  %v689_v16 = vld [vmem:[#allocation2 + $0xb8] sm:$0xff]  ;;  %v712_v20 = vadd.f32 %v1460_v9, %v673_v15  ;;  %v672_v22 = vld [vmem:[#allocation2 + $0x30] sm:$0xff]  ;;  %642 = vst.msk [vmem:[#allocation2 + $0x58] sm:$0xff] %vm268_vm0, %v609_v8 }
 0x161   : > { %v728_v21 = vadd.f32 %v1460_v9, %v689_v16  ;;  %v688_v23 = vld [vmem:[#allocation2 + $0xb0] sm:$0xff]  ;;  %658 = vst.msk [vmem:[#allocation2 + $0xd8] sm:$0xff] %vm268_vm0, %v625_v10  ;;  %v711_v25 = vadd.f32 %v1460_v9, %v672_v22  ;;  %641 = vst.msk [vmem:[#allocation2 + $0x50] sm:$0xff] %vm268_vm0, %v608_v17  ;;  %v980_v27 = vpop.f32.mrb[12].mxu0  ;;  %v1004_v28 = vpop.f32.mrb[12].mxu1 }
 0x162   : > { %v727_v26 = vadd.f32 %v1460_v9, %v688_v23  ;;  %657 = vst.msk [vmem:[#allocation2 + $0xd0] sm:$0xff] %vm268_vm0, %v624_v18  ;;  %744 = vst.msk [vmem:[%s1467_s23 + $0x38] sm:$0xff] %vm268_vm0, %v712_v20  ;;  %v611_v29 = vadd.f32 %v980_v27, %v314_v13  ;;  %v627_v30 = vadd.f32 %v1004_v28, %v330_v14  ;;  %v499_v31 = vpop.f32.mrb[13].mxu0  ;;  %v579_v32 = vpop.f32.mrb[13].mxu1 }
 0x163   : > { %760 = vst.msk [vmem:[%s1467_s23 + $0xb8] sm:$0xff] %vm268_vm0, %v728_v21  ;;  %743 = vst.msk [vmem:[%s1467_s23 + $0x30] sm:$0xff] %vm268_vm0, %v711_v25  ;;  %v675_v35 = vld [vmem:[#allocation2 + $0x48] sm:$0xff]  ;;  %v610_v37 = vadd.f32 %v499_v31, %v313_v19  ;;  %v626_v38 = vadd.f32 %v579_v32, %v329_v24 }
 0x164   : > { %759 = vst.msk [vmem:[%s1467_s23 + $0xb0] sm:$0xff] %vm268_vm0, %v727_v26  ;;  %v691_v36 = vld [vmem:[#allocation2 + $0xc8] sm:$0xff]  ;;  %v714_v40 = vadd.f32 %v1460_v9, %v675_v35  ;;  %v674_v42 = vld [vmem:[#allocation2 + $0x40] sm:$0xff]  ;;  %644 = vst.msk [vmem:[#allocation2 + $0x68] sm:$0xff] %vm268_vm0, %v611_v29 }
 0x165   : > { %v730_v41 = vadd.f32 %v1460_v9, %v691_v36  ;;  %v690_v43 = vld [vmem:[#allocation2 + $0xc0] sm:$0xff]  ;;  %660 = vst.msk [vmem:[#allocation2 + $0xe8] sm:$0xff] %vm268_vm0, %v627_v30  ;;  %v713_v45 = vadd.f32 %v1460_v9, %v674_v42  ;;  %643 = vst.msk [vmem:[#allocation2 + $0x60] sm:$0xff] %vm268_vm0, %v610_v37  ;;  %v983_v47 = vpop.f32.mrb[14].mxu0  ;;  %v1007_v48 = vpop.f32.mrb[14].mxu1 }
 0x166   : > { %v729_v46 = vadd.f32 %v1460_v9, %v690_v43  ;;  %659 = vst.msk [vmem:[#allocation2 + $0xe0] sm:$0xff] %vm268_vm0, %v626_v38  ;;  %746 = vst.msk [vmem:[%s1467_s23 + $0x48] sm:$0xff] %vm268_vm0, %v714_v40  ;;  %v613_v49 = vadd.f32 %v983_v47, %v316_v33  ;;  %v629_v50 = vadd.f32 %v1007_v48, %v332_v34  ;;  %v509_v51 = vpop.f32.mrb[15].mxu0  ;;  %v589_v52 = vpop.f32.mrb[15].mxu1 }
 0x167   : > { %762 = vst.msk [vmem:[%s1467_s23 + $0xc8] sm:$0xff] %vm268_vm0, %v730_v41  ;;  %745 = vst.msk [vmem:[%s1467_s23 + $0x40] sm:$0xff] %vm268_vm0, %v713_v45  ;;  %v677_v53 = vld [vmem:[#allocation2 + $0x58] sm:$0xff]  ;;  %v612_v55 = vadd.f32 %v509_v51, %v315_v39  ;;  %v628_v56 = vadd.f32 %v589_v52, %v331_v44 }
 0x168   : > { %761 = vst.msk [vmem:[%s1467_s23 + $0xc0] sm:$0xff] %vm268_vm0, %v729_v46  ;;  %v693_v54 = vld [vmem:[#allocation2 + $0xd8] sm:$0xff]  ;;  %v716_v57 = vadd.f32 %v1460_v9, %v677_v53  ;;  %v676_v59 = vld [vmem:[#allocation2 + $0x50] sm:$0xff]  ;;  %646 = vst.msk [vmem:[#allocation2 + $0x78] sm:$0xff] %vm268_vm0, %v613_v49 }
 0x169   : > { %v732_v58 = vadd.f32 %v1460_v9, %v693_v54  ;;  %v692_v60 = vld [vmem:[#allocation2 + $0xd0] sm:$0xff]  ;;  %662 = vst.msk [vmem:[#allocation2 + $0xf8] sm:$0xff] %vm268_vm0, %v629_v50  ;;  %v715_v61 = vadd.f32 %v1460_v9, %v676_v59  ;;  %645 = vst.msk [vmem:[#allocation2 + $0x70] sm:$0xff] %vm268_vm0, %v612_v55 }
 0x16a   : > { %v731_v62 = vadd.f32 %v1460_v9, %v692_v60  ;;  %661 = vst.msk [vmem:[#allocation2 + $0xf0] sm:$0xff] %vm268_vm0, %v628_v56  ;;  %748 = vst.msk [vmem:[%s1467_s23 + $0x58] sm:$0xff] %vm268_vm0, %v716_v57 }
 0x16b   : > { %764 = vst.msk [vmem:[%s1467_s23 + $0xd8] sm:$0xff] %vm268_vm0, %v732_v58  ;;  %747 = vst.msk [vmem:[%s1467_s23 + $0x50] sm:$0xff] %vm268_vm0, %v715_v61  ;;  %v679_v63 = vld [vmem:[#allocation2 + $0x68] sm:$0xff] }
 0x16c   : > { %763 = vst.msk [vmem:[%s1467_s23 + $0xd0] sm:$0xff] %vm268_vm0, %v731_v62  ;;  %v695_v0 = vld [vmem:[#allocation2 + $0xe8] sm:$0xff]  ;;  %v718_v1 = vadd.f32 %v1460_v9, %v679_v63  ;;  %v678_v3 = vld [vmem:[#allocation2 + $0x60] sm:$0xff] }
 0x16d   : > { %v734_v2 = vadd.f32 %v1460_v9, %v695_v0  ;;  %v694_v4 = vld [vmem:[#allocation2 + $0xe0] sm:$0xff]  ;;  %v717_v5 = vadd.f32 %v1460_v9, %v678_v3 }
 0x16e   : > { %v733_v6 = vadd.f32 %v1460_v9, %v694_v4  ;;  %750 = vst.msk [vmem:[%s1467_s23 + $0x68] sm:$0xff] %vm268_vm0, %v718_v1 }
 0x16f   : > { %766 = vst.msk [vmem:[%s1467_s23 + $0xe8] sm:$0xff] %vm268_vm0, %v734_v2  ;;  %749 = vst.msk [vmem:[%s1467_s23 + $0x60] sm:$0xff] %vm268_vm0, %v717_v5  ;;  %v681_v7 = vld [vmem:[#allocation2 + $0x78] sm:$0xff] }
 0x170   : > { %765 = vst.msk [vmem:[%s1467_s23 + $0xe0] sm:$0xff] %vm268_vm0, %v733_v6  ;;  %v697_v8 = vld [vmem:[#allocation2 + $0xf8] sm:$0xff]  ;;  %v720_v10 = vadd.f32 %v1460_v9, %v681_v7  ;;  %v680_v12 = vld [vmem:[#allocation2 + $0x70] sm:$0xff] }
 0x171   : > { %v736_v11 = vadd.f32 %v1460_v9, %v697_v8  ;;  %v696_v13 = vld [vmem:[#allocation2 + $0xf0] sm:$0xff]  ;;  %v719_v14 = vadd.f32 %v1460_v9, %v680_v12 }
 0x172   : > { %v735_v15 = vadd.f32 %v1460_v9, %v696_v13  ;;  %752 = vst.msk [vmem:[%s1467_s23 + $0x78] sm:$0xff] %vm268_vm0, %v720_v10 }
 0x173   : > { %768 = vst.msk [vmem:[%s1467_s23 + $0xf8] sm:$0xff] %vm268_vm0, %v736_v11  ;;  %751 = vst.msk [vmem:[%s1467_s23 + $0x70] sm:$0xff] %vm268_vm0, %v719_v14 }
 0x174   : > { %767 = vst.msk [vmem:[%s1467_s23 + $0xf0] sm:$0xff] %vm268_vm0, %v735_v15 }
 0x175 PF: > { %s17_s17 = sadd.s32 1, %s1213_s17   ;;  %s1623_s12 = smov %s1197_s13 }
 0x176   : > { %p14_p1 = scmp.ge.s32.totalorder %s17_s17, 4   ;;  %s1624_s13 = smov %s1201_s14 }
 0x177   : > { %s1625_s14 = smov %s1326_s26  ;;  %s1626_s15 = smov %s1209_s16 }
 0x178   : > { %s1627_s16 = smov %s1629_s25  ;;  %16 = sbr.rel (!%p14_p1) target bundleno = 5 (0x5), region = 88 }
 0x17f   :  { %797 = vsyncpa [#allocation4], 1 }
 0x180   :  { %799 = vsyncpa [#allocation4 + $0x1], 1 }
 0x181   :  { %800 = vsyncpa [#allocation6], 1 }

</bundles_post_ra>
